<compile_context>
chip_gen: v7x
topology: tpu7x:2x2x1
jax: 0.10.0
libtpu: 0.0.40
codegen_flags: <defaults>
</compile_context>

<pallas_src>
import jax
import jax.numpy as jnp
from jax.experimental import pallas as pl
from jax.experimental.pallas import tpu as pltpu

L = 128  # batch elements per block row (output lane width)


def perceptron_and_kernel(b_ref, x_ref, w_ref, o_ref):
    # b_ref: SMEM (1,)          f32  = 0.5 * bias
    # x_ref: VMEM (TILE_R, 2L)  f32  row-major interleaved (x0, x1) pairs
    # w_ref: VMEM (2L, L)       f32  banded de-interleave weights (0.5*w folded)
    # o_ref: VMEM (TILE_R, L)   f32  dense output slab
    zh = jnp.dot(x_ref[...], w_ref[...], preferred_element_type=jnp.float32)
    zh = zh + b_ref[0]                       # zh = 0.5 * (w0*x0 + w1*x1 + b)
    # sigmoid(z) = 0.5 * tanh(z / 2) + 0.5   (one EUP push, saturates cleanly)
    o_ref[...] = (0.5 * jnp.tanh(zh) + 0.5).astype(o_ref.dtype)


def perceptron_and(x, w, b, *, block_rows=2048):
    """x: (N, 2), w: (1, 2), b: (1,) — same parameters as nn.Linear(2, 1)."""
    N = x.shape[0]
    x = x.astype(jnp.float32)

    # Row-block geometry: each block row carries L batch elements (2L lanes in,
    # L lanes out).  Keep the row tile a multiple of 8 sublanes and cap it so
    # the grid has >= 2 steps whenever possible (v7x megacore sharding).
    rows = pl.cdiv(N, L)
    rows8 = pl.cdiv(rows, 8) * 8
    tile_r = min(block_rows, max(8, (rows8 // 16) * 8))
    rows_pad = pl.cdiv(rows8, tile_r) * tile_r
    n_pad = rows_pad * L

    if n_pad != N:
        # Only hit when N is not tile-aligned; aligned batches are copy-free.
        x = jnp.pad(x, ((0, n_pad - N), (0, 0)))
    x_int = x.reshape(rows_pad, 2 * L)          # metadata-only reshape

    # Banded de-interleave weights: W[2l, l] = w0/2, W[2l+1, l] = w1/2, else 0.
    wv = 0.5 * w.reshape(-1).astype(jnp.float32)          # (2,)
    eye = jnp.eye(L, dtype=jnp.float32)                   # (L, L)
    W = (eye[:, None, :] * wv[None, :, None]).reshape(2 * L, L)
    b_half = 0.5 * b.reshape(-1).astype(jnp.float32)      # (1,) SMEM scalar

    out = pl.pallas_call(
        perceptron_and_kernel,
        out_shape=jax.ShapeDtypeStruct((rows_pad, L), jnp.float32),
        grid=(rows_pad // tile_r,),
        in_specs=[
            pl.BlockSpec(memory_space=pltpu.MemorySpace.SMEM),   # 0.5*b scalar
            pl.BlockSpec((tile_r, 2 * L), lambda i: (i, 0)),     # x row-blocks
            pl.BlockSpec((2 * L, L), lambda i: (0, 0)),          # W, resident
        ],
        out_specs=pl.BlockSpec((tile_r, L), lambda i: (i, 0)),   # dense output
        compiler_params=pltpu.CompilerParams(
            dimension_semantics=("parallel",),   # shard row-blocks across TCs
        ),
    )(b_half, x_int, W)

    # Back to the PyTorch layout (N, 1).  Metadata-only when n_pad == N.
    out = out.reshape(-1)
    if n_pad != N:
        out = out[:N]
    return out.reshape(N, 1)


if __name__ == "__main__":
    key = jax.random.PRNGKey(0)
    kx, kw, kb = jax.random.split(key, 3)

    # nn.Linear(2, 1) init: uniform(-1/sqrt(in_features), 1/sqrt(in_features))
    bound = 1.0 / jnp.sqrt(2.0)
    w = jax.random.uniform(kw, (1, 2), jnp.float32, minval=-bound, maxval=bound)
    b = jax.random.uniform(kb, (1,), jnp.float32, minval=-bound, maxval=bound)

    # Small deterministic input batch (N, 2)
    x = jax.random.normal(kx, (8, 2), jnp.float32)

    out = perceptron_and(x, w, b)
    out = jax.block_until_ready(out)

    # Reference check in plain JAX
    ref = jax.nn.sigmoid(x @ w.T + b)
    assert out.shape == (8, 1)
    assert jnp.allclose(out, ref, atol=1e-4, rtol=1e-4), (out, ref)

    print("KERNEL_OK")
</pallas_src>

<mosaic_0001>
module attributes {stable_mosaic.version = 11 : i64} {
  func.func @perceptron_and_kernel(%arg0: i32, %arg1: memref<1xf32, #tpu.memory_space<smem>>, %arg2: memref<8x256xf32, #tpu.memory_space<vmem>>, %arg3: memref<256x128xf32, #tpu.memory_space<vmem>>, %arg4: memref<8x128xf32, #tpu.memory_space<vmem>>) attributes {dimension_semantics = [#tpu.dimension_semantics<parallel>], iteration_bounds = array<i64: 1>, scalar_prefetch = 0 : i64, scratch_operands = 0 : i64, tpu.core_type = #tpu.core_type<tc>, window_params = [{transform_indices = @transform_0, window_bounds = array<i64: 1>}, {transform_indices = @transform_1, window_bounds = array<i64: 8, 256>}, {pipeline_mode = #tpu.pipeline_mode<synchronous>, transform_indices = @transform_2, window_bounds = array<i64: 256, 128>}, {transform_indices = @transform_3, window_bounds = array<i64: 8, 128>}]} {
    %c0 = arith.constant 0 : index
    %c0_0 = arith.constant 0 : index
    %0 = vector.load %arg2[%c0, %c0_0] : memref<8x256xf32, #tpu.memory_space<vmem>>, vector<8x256xf32>
    %c0_1 = arith.constant 0 : index
    %c0_2 = arith.constant 0 : index
    %1 = vector.load %arg3[%c0_1, %c0_2] : memref<256x128xf32, #tpu.memory_space<vmem>>, vector<256x128xf32>
    %cst = arith.constant dense<0.000000e+00> : vector<8x128xf32>
    %2 = tpu.matmul %0, %1, %cst {dimension_numbers = #tpu.dot_dimension_numbers<[1], [0], [0], [1], [0, 0, 1, 1], [], []>} : vector<8x256xf32>, vector<256x128xf32>, vector<8x128xf32> -> vector<8x128xf32>
    %c0_3 = arith.constant 0 : index
    %3 = memref.load %arg1[%c0_3] : memref<1xf32, #tpu.memory_space<smem>>
    %4 = vector.broadcast %3 : f32 to vector<8x128xf32>
    %5 = arith.addf %2, %4 : vector<8x128xf32>
    %6 = math.tanh %5 : vector<8x128xf32>
    %cst_4 = arith.constant 5.000000e-01 : f32
    %7 = vector.broadcast %cst_4 : f32 to vector<8x128xf32>
    %8 = arith.mulf %7, %6 : vector<8x128xf32>
    %cst_5 = arith.constant 5.000000e-01 : f32
    %9 = vector.broadcast %cst_5 : f32 to vector<8x128xf32>
    %10 = arith.addf %8, %9 : vector<8x128xf32>
    %c0_6 = arith.constant 0 : index
    %c0_7 = arith.constant 0 : index
    %11 = vector.load %arg4[%c0_6, %c0_7] : memref<8x128xf32, #tpu.memory_space<vmem>>, vector<8x128xf32>
    tpu.vector_store %arg4[%c0_6, %c0_7], %10 {strides = array<i32>} : memref<8x128xf32, #tpu.memory_space<vmem>>, vector<8x128xf32>,
    return
  }
  func.func @transform_0(%arg0: i32) -> i32 {
    %c0_i32 = arith.constant 0 : i32
    %c0_i32_0 = arith.constant 0 : i32
    return %c0_i32 : i32
  }
  func.func @transform_1(%arg0: i32) -> (i32, i32) {
    %c0_i32 = arith.constant 0 : i32
    %c0_i32_0 = arith.constant 0 : i32
    return %arg0, %c0_i32 : i32, i32
  }
  func.func @transform_2(%arg0: i32) -> (i32, i32) {
    %c0_i32 = arith.constant 0 : i32
    %c0_i32_0 = arith.constant 0 : i32
    %c0_i32_1 = arith.constant 0 : i32
    return %c0_i32, %c0_i32_0 : i32, i32
  }
  func.func @transform_3(%arg0: i32) -> (i32, i32) {
    %c0_i32 = arith.constant 0 : i32
    %c0_i32_0 = arith.constant 0 : i32
    return %arg0, %c0_i32 : i32, i32
  }
}

</mosaic_0001>

<bundles_post_ra>
// kernel: tpu_custom_call.1
= control target key start
LH: loop header
LB: loop body
LE: loop exit
PB: predicated region body
PF: predicated region fallthrough
CT: control target
= control target key end

     0   :  { %9 = vsyncpa [#allocation4], 0  ;;  %s385_s0 = inlined_call_operand.<no memory space> [shape: f32[1], index: 0, kind: input, shape index: {}]   ;;  %s386_s1 = inlined_call_operand.hbm [shape: f32[8,256], index: 1, kind: input, shape index: {}]   ;;  %s387_s2 = inlined_call_operand.hbm [shape: f32[256,128], index: 2, kind: input, shape index: {}]   ;;  %s388_s3 = inlined_call_operand.hbm [shape: f32[8,128], index: 3, kind: output, shape index: {}]  }
   0x1   :  { %10 = vsyncpa [#allocation7], 0 }
   0x2   :  { %11 = vsyncpa [#allocation5], 0  ;;  %s314_s12 = smov [#allocation3]   ;;  %s315_s14 = smov [#allocation6]  }
   0x3   :  { %s20_s13 = sshll.u32 %s314_s12, 4  ;;  %s29_s15 = sshll.u32 %s315_s14, 4  ;;  %s21_s13 = int_to_ptr.vmem [resolvable:$true] %s20_s13  ;;  %s339_s15 = int_to_ptr.vmem [resolvable:$true] %s29_s15 }
   0x4   :  { %s242_s18 = scalar_lea.hbm %s386_s1, 256 }
   0x5   :  { %p243_p0 = scmp.ne.s32.totalorder %s386_s1, %s242_s18  ;;  %p246_p1 = scmp.lt.u32.totalorder %s242_s18, %s386_s1 }
   0x7   :  { %p248_p2 = pnand %p246_p1, %p243_p0 }
   0x9   :  { %251 = shalt.err (!%p248_p2)
}
   0xa   :  { %s252_s23 = scalar_lea.vmem %s21_s13, 256  ;;  %p257_p4 = scmp.lt.s32.totalorder %s21_s13, %s21_s13 }
   0xb   :  { %p253_p3 = scmp.ne.s32.totalorder %s21_s13, %s252_s23  ;;  %p258_p5 = scmp.lt.s32.totalorder %s252_s23, %s252_s23 }
   0xd   :  { %p259_p6 = por %p258_p5, %p257_p4 }
   0xf   :  { %p260_p7 = pnand %p259_p6, %p253_p3 }
  0x11   :  { %263 = shalt.err (!%p260_p7)
}
  0x12   :  { %23 = dma.hbm_to_vmem [thread:$0]  %s386_s1, 256, %s21_s13, [#allocation4]  }
  0x13   :  { %s264_s28 = scalar_lea.hbm %s387_s2, 4096 }
  0x14   :  { %p265_p8 = scmp.ne.s32.totalorder %s387_s2, %s264_s28  ;;  %p268_p9 = scmp.lt.u32.totalorder %s264_s28, %s387_s2 }
  0x16   :  { %p270_p10 = pnand %p268_p9, %p265_p8 }
  0x18   :  { %273 = shalt.err (!%p270_p10)
}
  0x19   :  { %s274_s6 = scalar_lea.vmem %s339_s15, 4096  ;;  %p279_p12 = scmp.lt.s32.totalorder %s339_s15, %s339_s15 }
  0x1a   :  { %p275_p11 = scmp.ne.s32.totalorder %s339_s15, %s274_s6  ;;  %p280_p13 = scmp.lt.s32.totalorder %s274_s6, %s274_s6 }
  0x1c   :  { %p281_p0 = por %p280_p13, %p279_p12 }
  0x1e   :  { %p282_p1 = pnand %p281_p0, %p275_p11 }
  0x20   :  { %285 = shalt.err (!%p282_p1)
}
  0x21   :  { %s316_s1 = smov 128   ;;  %s317_s7 = smov 8  }
  0x22   :  { %35 = dma.hbm_to_vmem [thread:$0]  %s387_s2, 4096, %s339_s15, [#allocation7], %s316_s1, %s316_s1, %s317_s7  }
  0x23   :  { %308 = dma.done.wait [#allocation4], 256  }
  0x24   :  { %309 = vsyncadd [#allocation4], 4294967040 }
  0x25   :  { %310 = dma.done.wait [#allocation7], 4096  }
  0x26   :  { %311 = vsyncadd [#allocation7], 4294963200  ;;  %v60_v0 = vld [vmem:[#allocation6 + $0x80] sm:$0xff]  ;;  %v61_v1 = vld [vmem:[#allocation6 + $0x88] sm:$0xff]  ;;  %v77_v51 = vstv %s385_s0  ;;  %s318_s11 = smov [#allocation8]  }
  0x27   :  { %v44_v2 = vld [vmem:[#allocation6] sm:$0xff]  ;;  %v203_v3 = vpack.c.bf16 %v61_v1, %v60_v0  ;;  %v45_v4 = vld [vmem:[#allocation6 + $0x8] sm:$0xff]  ;;  %v62_v5 = vld [vmem:[#allocation6 + $0x90] sm:$0xff]  ;;  %s158_s12 = sshll.u32 %s318_s11, 4  ;;  %s159_s12 = int_to_ptr.vmem [resolvable:$true] %s158_s12 }
  0x28   :  { %v63_v6 = vld [vmem:[#allocation6 + $0x98] sm:$0xff]  ;;  %v205_v7 = vpack.c.bf16 %v45_v4, %v44_v2  ;;  %v46_v9 = vld [vmem:[#allocation6 + $0x10] sm:$0xff]  ;;  %v64_v11 = vld [vmem:[#allocation6 + $0xa0] sm:$0xff]  ;;  %s286_s13 = scalar_lea.vmem %s159_s12, 128  ;;  %p291_p3 = scmp.lt.s32.totalorder %s159_s12, %s159_s12 }
  0x29   :  { %v207_v8 = vpack.c.bf16 %v63_v6, %v62_v5  ;;  %v47_v10 = vld [vmem:[#allocation6 + $0x18] sm:$0xff]  ;;  %204 = vmatprep.subr.bf16.mxu0 %v203_v3  ;;  %v65_v12 = vld [vmem:[#allocation6 + $0xa8] sm:$0xff]  ;;  %v48_v15 = vld [vmem:[#allocation6 + $0x20] sm:$0xff]  ;;  %p287_p2 = scmp.ne.s32.totalorder %s159_s12, %s286_s13  ;;  %p292_p4 = scmp.lt.s32.totalorder %s286_s13, %s286_s13 }
  0x2a   :  { %206 = vmatpush3.bf16.msra.mxu0 %v205_v7  ;;  %v209_v13 = vpack.c.bf16 %v47_v10, %v46_v9  ;;  %v211_v14 = vpack.c.bf16 %v65_v12, %v64_v11  ;;  %v49_v16 = vld [vmem:[#allocation6 + $0x28] sm:$0xff]  ;;  %v66_v17 = vld [vmem:[#allocation6 + $0xb0] sm:$0xff]  ;;  %v67_v18 = vld [vmem:[#allocation6 + $0xb8] sm:$0xff] }
  0x2b   :  { %208 = vmatprep.subr.bf16.mxu0 %v207_v8  ;;  %v213_v19 = vpack.c.bf16 %v49_v16, %v48_v15  ;;  %v215_v20 = vpack.c.bf16 %v67_v18, %v66_v17  ;;  %v50_v21 = vld [vmem:[#allocation6 + $0x30] sm:$0xff]  ;;  %v51_v22 = vld [vmem:[#allocation6 + $0x38] sm:$0xff]  ;;  %v68_v23 = vld [vmem:[#allocation6 + $0xc0] sm:$0xff]  ;;  %p293_p5 = por %p292_p4, %p291_p3 }
  0x2c   :  { %v69_v24 = vld [vmem:[#allocation6 + $0xc8] sm:$0xff]  ;;  %v43_v25 = vld [vmem:[#allocation3 + $0x8] sm:$0xff]  ;;  %v217_v26 = vpack.c.bf16 %v51_v22, %v50_v21  ;;  %v52_v28 = vld [vmem:[#allocation6 + $0x40] sm:$0xff] }
  0x2d   :  { %142 = vmatprep.mubr.f32.mxu0 %v43_v25  ;;  %v219_v27 = vpack.c.bf16 %v69_v24, %v68_v23  ;;  %v53_v29 = vld [vmem:[#allocation6 + $0x48] sm:$0xff]  ;;  %v70_v30 = vld [vmem:[#allocation6 + $0xd0] sm:$0xff]  ;;  %v71_v31 = vld [vmem:[#allocation6 + $0xd8] sm:$0xff]  ;;  %p294_p6 = pnand %p293_p5, %p287_p2 }
  0x2e   :  { %210 = vmatpush3.bf16.msra.mxu0 %v209_v13  ;;  %v221_v32 = vpack.c.bf16 %v53_v29, %v52_v28  ;;  %v223_v33 = vpack.c.bf16 %v71_v31, %v70_v30  ;;  %v54_v34 = vld [vmem:[#allocation6 + $0x50] sm:$0xff]  ;;  %v55_v35 = vld [vmem:[#allocation6 + $0x58] sm:$0xff]  ;;  %v72_v36 = vld [vmem:[#allocation6 + $0xe0] sm:$0xff] }
  0x2f   :  { %212 = vmatprep.subr.bf16.mxu0 %v211_v14  ;;  %v73_v37 = vld [vmem:[#allocation6 + $0xe8] sm:$0xff]  ;;  %v225_v38 = vpack.c.bf16 %v55_v35, %v54_v34  ;;  %v56_v40 = vld [vmem:[#allocation6 + $0x60] sm:$0xff]  ;;  %v74_v42 = vld [vmem:[#allocation6 + $0xf0] sm:$0xff] }
  0x30   :  { %v227_v39 = vpack.c.bf16 %v73_v37, %v72_v36  ;;  %v57_v41 = vld [vmem:[#allocation6 + $0x68] sm:$0xff]  ;;  %v75_v43 = vld [vmem:[#allocation6 + $0xf8] sm:$0xff]  ;;  %v58_v46 = vld [vmem:[#allocation6 + $0x70] sm:$0xff] }
  0x31   :  { %v229_v44 = vpack.c.bf16 %v57_v41, %v56_v40  ;;  %v231_v45 = vpack.c.bf16 %v75_v43, %v74_v42  ;;  %v59_v47 = vld [vmem:[#allocation6 + $0x78] sm:$0xff]  ;;  %v42_v49 = vld [vmem:[#allocation3] sm:$0xff] }
  0x32   :  { %214 = vmatpush3.bf16.msra.mxu0 %v213_v19  ;;  %v233_v48 = vpack.c.bf16 %v59_v47, %v58_v46 }
  0x33   :  { %216 = vmatprep.subr.bf16.mxu0 %v215_v20 }
  0x36   :  { %218 = vmatpush3.bf16.msra.mxu0 %v217_v26 }
  0x37   :  { %220 = vmatprep.subr.bf16.mxu0 %v219_v27 }
  0x3a   :  { %222 = vmatpush3.bf16.msra.mxu0 %v221_v32 }
  0x3b   :  { %224 = vmatprep.subr.bf16.mxu0 %v223_v33 }
  0x3e   :  { %226 = vmatpush3.bf16.msra.mxu0 %v225_v38 }
  0x3f   :  { %228 = vmatprep.subr.bf16.mxu0 %v227_v39 }
  0x42   :  { %230 = vmatpush3.bf16.msra.mxu0 %v229_v44 }
  0x43   :  { %232 = vmatprep.subr.bf16.mxu0 %v231_v45 }
  0x46   :  { %234 = vmatpush3.bf16.msra.mxu0 %v233_v48 }
  0x49   :  { %143 = vmatmul.mubr.f32.vlgmr.msra.gmra.mrb[0].mxu0 %v42_v49 }
 0x11c   :  { %v200_v50 = vpop.f32.mrb[0].mxu0 }
 0x11d   :  { %v201_v52 = vpop.f32.mrb[1].mxu0 }
 0x11e   :  { %v202_v53 = vadd.f32 %v201_v52, %v200_v50 }
 0x120   :  { %v145_v54 = vadd.f32 %v202_v53, %v77_v51 }
 0x122   :  { %240 = vtanh.f32 %v145_v54 }
 0x12c   :  { %v241_v55 = vpop.eup %240 }
 0x12d   :  { %v149_v56 = vmul.f32 0.5, %v241_v55 }
 0x12f   :  { %v150_v57 = vadd.f32 0.5, %v149_v56 }
 0x131   :  { %151 = vst [vmem:[#allocation8] sm:$0xff] %v150_v57 }
 0x132   :  { %297 = shalt.err (!%p294_p6)
}
 0x133   :  { %s298_s15 = scalar_lea.hbm %s388_s3, 128 }
 0x134   :  { %p299_p7 = scmp.ne.s32.totalorder %s388_s3, %s298_s15  ;;  %p302_p8 = scmp.lt.u32.totalorder %s298_s15, %s388_s3 }
 0x136   :  { %p304_p9 = pnand %p302_p8, %p299_p7 }
 0x138   :  { %307 = shalt.err (!%p304_p9)
}
 0x139   :  { %161 = dma.vmem_to_hbm [thread:$0]  %s159_s12, 128, %s388_s3, [#allocation5]  }
 0x13a   :  { %312 = dma.done.wait [#allocation5], 128  }
 0x13b   :  { %313 = vsyncadd [#allocation5], 4294967168 }
 0x13c   :  { %165 = vsyncpa [#allocation4], 1 }
 0x13d   :  { %166 = vsyncpa [#allocation7], 1 }
 0x13e   :  { %167 = vsyncpa [#allocation5], 1 }

</bundles_post_ra>
